<compile_context>
chip_gen: v6e
topology: v6e:2x2x1
jax: 0.10.0
libtpu: 0.0.40
codegen_flags: <defaults>
</compile_context>

<pallas_src>
import functools

import jax
import jax.numpy as jnp
from jax.experimental import pallas as pl
from jax.experimental.pallas import tpu as pltpu

LANE = 128                         # vreg lane width
SUB = 8                            # vreg sublane count
TARGET_BLOCK_BYTES = 4 * 1024 * 1024   # ~4 MiB per input block (dtype-aware rows)


def _num_tensorcores():
    """1 on v5e/v6e (single TC), 2 on v7x; conservative fallback is 1."""
    try:
        kind = jax.devices()[0].device_kind.lower()
    except Exception:
        return 1
    return 2 if ("v7" in kind or "7x" in kind) else 1


def _mse_partial_kernel(yt_ref, yr_ref, out_ref, *,
                        tile_rows, tiles_per_core, rows_valid, need_mask):
    """Accumulate sum((yt - yr)^2) for this core's row range into an (8, 128)
    f32 output block that stays resident across the reduction grid axis."""
    c = pl.program_id(0)   # core / stream split  ("parallel")
    j = pl.program_id(1)   # reduction step       ("arbitrary")

    @pl.when(j == 0)
    def _init():
        out_ref[...] = jnp.zeros_like(out_ref)

    # Widen to f32 on the VPU: HBM traffic stays at the native dtype width.
    d = yt_ref[...].astype(jnp.float32) - yr_ref[...].astype(jnp.float32)
    # (tile_rows, 128) -> (tile_rows//8, 8, 128): summing the leading axis is
    # plain vreg-wise VPU adds; no per-step cross-lane reduce, no SMEM RMW.
    sq = (d * d).reshape(tile_rows // SUB, SUB, LANE)

    if not need_mask:
        out_ref[...] += jnp.sum(sq, axis=0).reshape(1, SUB, LANE)
    else:
        t = c * tiles_per_core + j
        tile_end = (t + 1) * tile_rows

        # Full interior tiles skip all masking work.
        @pl.when(tile_end <= rows_valid)
        def _full():
            out_ref[...] += jnp.sum(sq, axis=0).reshape(1, SUB, LANE)

        # Straddling last tile / phantom (clamped) tiles: mask at 8-row-group
        # granularity.  rows_valid is always a multiple of 8, so this is exact.
        # Masking happens after squaring, which is still correct for garbage
        # OOB values (where() selects, it does not multiply).
        @pl.when(tile_end > rows_valid)
        def _tail():
            g = jax.lax.broadcasted_iota(
                jnp.int32, (tile_rows // SUB, SUB, LANE), 0)
            valid = (t * tile_rows + (g + 1) * SUB) <= rows_valid
            masked = jnp.where(valid, sq, jnp.float32(0.0))
            out_ref[...] += jnp.sum(masked, axis=0).reshape(1, SUB, LANE)


def vae_loss(y_true, y_recon, z_mean, z_log_var):
    """VAELoss.forward(y_true, (y_recon, z_mean, z_log_var)) -> scalar f32."""
    assert y_true.shape == y_recon.shape
    n = y_true.size  # true element count for the mean

    yt = y_true.reshape(-1)      # contiguous flatten: free (no copy)
    yr = y_recon.reshape(-1)

    align = SUB * LANE           # 1024
    n_main = (n // align) * align

    sq_sum = jnp.float32(0.0)

    if n_main:
        rows = n_main // LANE    # always a multiple of 8
        yt_main = yt[:n_main].reshape(rows, LANE)
        yr_main = yr[:n_main].reshape(rows, LANE)

        itemsize = jnp.dtype(y_true.dtype).itemsize
        # ~4 MiB per input block: 8192 rows (f32) / 16384 rows (bf16).
        tile_rows = min(rows, TARGET_BLOCK_BYTES // (LANE * itemsize))
        total_tiles = -(-rows // tile_rows)
        cores = min(_num_tensorcores(), total_tiles)
        tiles_per_core = -(-total_tiles // cores)
        need_mask = (cores * tiles_per_core * tile_rows) != rows
        grid = (cores, tiles_per_core)

        def data_map(c, j):
            t = c * tiles_per_core + j
            return (jnp.minimum(t, total_tiles - 1), 0)   # clamp phantom tiles

        kernel = functools.partial(
            _mse_partial_kernel,
            tile_rows=tile_rows,
            tiles_per_core=tiles_per_core,
            rows_valid=rows,
            need_mask=need_mask,
        )

        # VMEM budget: 2 inputs x 2 pipeline buffers x block + ~4 block-sized
        # f32 temporaries + slack.  f32 ~36 MiB, bf16 ~52 MiB — capped under
        # v7x's 64 MiB physical VMEM per TensorCore.
        block_bytes = tile_rows * LANE * itemsize
        widened_bytes = tile_rows * LANE * 4
        vmem_limit = min(4 * block_bytes + 4 * widened_bytes + (4 << 20),
                         56 * 1024 * 1024)

        cost = pl.CostEstimate(
            flops=3 * n_main,
            transcendentals=0,
            bytes_accessed=2 * n_main * itemsize + cores * SUB * LANE * 4,
        )

        # TODO(synk): on v7x, if profiling shows the leading "parallel" axis is
        # not actually sharded across the two TensorCores, switch it to
        # pltpu.CORE_PARALLEL (kept as "parallel" here for portability).
        partials = pl.pallas_call(
            kernel,
            out_shape=jax.ShapeDtypeStruct((cores, SUB, LANE), jnp.float32),
            grid_spec=pltpu.PrefetchScalarGridSpec(
                num_scalar_prefetch=0,
                grid=grid,
                in_specs=[
                    pl.BlockSpec((tile_rows, LANE), data_map),
                    pl.BlockSpec((tile_rows, LANE), data_map),
                ],
                out_specs=pl.BlockSpec((1, SUB, LANE), lambda c, j: (c, 0, 0)),
            ),
            compiler_params=pltpu.CompilerParams(
                dimension_semantics=("parallel", "arbitrary"),
                vmem_limit_bytes=vmem_limit,
            ),
            cost_estimate=cost,
        )(yt_main, yr_main)

        sq_sum = jnp.sum(partials)

    if n_main != n:
        # <1024-element unaligned tail: plain JAX (avoids padding/copying the
        # big reconstruction tensors in the wrapper).
        tail_d = yt[n_main:].astype(jnp.float32) - yr[n_main:].astype(jnp.float32)
        sq_sum = sq_sum + jnp.sum(tail_d * tail_d)

    mse = sq_sum / jnp.float32(n)

    # KL term: tiny (B, latent) tensor — plain JAX in the wrapper.
    zm = z_mean.astype(jnp.float32)
    zlv = z_log_var.astype(jnp.float32)
    kl = jnp.mean(-0.5 * (1.0 + zlv - jnp.square(zm) - jnp.exp(zlv)))

    return mse + kl


def vae_loss_ref(y_true, y_recon, z_mean, z_log_var):
    mse = jnp.mean((y_true.astype(jnp.float32) - y_recon.astype(jnp.float32)) ** 2)
    zm = z_mean.astype(jnp.float32)
    zlv = z_log_var.astype(jnp.float32)
    kl = jnp.mean(-0.5 * (1.0 + zlv - jnp.square(zm) - jnp.exp(zlv)))
    return mse + kl


if __name__ == "__main__":
    key = jax.random.PRNGKey(0)
    k1, k2, k3, k4 = jax.random.split(key, 4)

    B, C, H, W = 2, 4, 16, 16   # NCHW reconstruction target / output
    latent = 32                 # latent dimension for z_mean / z_log_var

    y_true = jax.random.normal(k1, (B, C, H, W), dtype=jnp.float32)
    y_recon = jax.random.normal(k2, (B, C, H, W), dtype=jnp.float32)
    z_mean = jax.random.normal(k3, (B, latent), dtype=jnp.float32) * 0.5
    z_log_var = jax.random.normal(k4, (B, latent), dtype=jnp.float32) * 0.1

    loss_fn = jax.jit(vae_loss)

    out = jax.block_until_ready(loss_fn(y_true, y_recon, z_mean, z_log_var))
    ref = vae_loss_ref(y_true, y_recon, z_mean, z_log_var)
    assert jnp.allclose(out, ref, rtol=1e-5, atol=1e-5), (out, ref)

    # Ragged shape (1554 elements): 1024-aligned prefix through the kernel,
    # 530-element tail summed in plain JAX.
    yt2 = jax.random.normal(k1, (2, 3, 7, 37), dtype=jnp.float32)
    yr2 = jax.random.normal(k2, (2, 3, 7, 37), dtype=jnp.float32)
    out2 = jax.block_until_ready(loss_fn(yt2, yr2, z_mean, z_log_var))
    ref2 = vae_loss_ref(yt2, yr2, z_mean, z_log_var)
    assert jnp.allclose(out2, ref2, rtol=1e-5, atol=1e-5), (out2, ref2)

    # Native bf16 reconstruction tensors (streamed at bf16, widened in-kernel;
    # dtype-aware tiling uses 2x the rows per block).
    yt3 = y_true.astype(jnp.bfloat16)
    yr3 = y_recon.astype(jnp.bfloat16)
    out3 = jax.block_until_ready(loss_fn(yt3, yr3, z_mean, z_log_var))
    ref3 = vae_loss_ref(yt3, yr3, z_mean, z_log_var)
    assert jnp.allclose(out3, ref3, rtol=1e-5, atol=1e-5), (out3, ref3)

    print("KERNEL_OK")
</pallas_src>

<mosaic_0001>
module attributes {stable_mosaic.version = 11 : i64} {
  func.func @_mse_partial_kernel(%arg0: i32, %arg1: i32, %arg2: memref<16x128xf32, #tpu.memory_space<vmem>>, %arg3: memref<16x128xf32, #tpu.memory_space<vmem>>, %arg4: memref<1x8x128xf32, #tpu.memory_space<vmem>>) attributes {dimension_semantics = [#tpu.dimension_semantics<parallel>, #tpu.dimension_semantics<arbitrary>], iteration_bounds = array<i64: 1, 1>, scalar_prefetch = 0 : i64, scratch_operands = 0 : i64, tpu.core_type = #tpu.core_type<tc>, window_params = [{transform_indices = @transform_0, window_bounds = array<i64: 16, 128>}, {transform_indices = @transform_1, window_bounds = array<i64: 16, 128>}, {transform_indices = @transform_2, window_bounds = array<i64: 1, 8, 128>}]} {
    %c0_i32 = arith.constant 0 : i32
    %0 = arith.cmpi eq, %arg1, %c0_i32 : i32
    %1 = arith.extui %0 : i1 to i32
    %c0_i32_0 = arith.constant 0 : i32
    %2 = arith.cmpi ne, %1, %c0_i32_0 : i32
    scf.if %2 {
      %cst_10 = arith.constant 0.000000e+00 : f32
      %13 = vector.broadcast %cst_10 : f32 to vector<1x8x128xf32>
      %c0_11 = arith.constant 0 : index
      %c0_12 = arith.constant 0 : index
      %c0_13 = arith.constant 0 : index
      %14 = vector.load %arg4[%c0_11, %c0_12, %c0_13] : memref<1x8x128xf32, #tpu.memory_space<vmem>>, vector<1x8x128xf32>
      tpu.vector_store %arg4[%c0_11, %c0_12, %c0_13], %13 {strides = array<i32>} : memref<1x8x128xf32, #tpu.memory_space<vmem>>, vector<1x8x128xf32>,
    } else {
    }
    %c0 = arith.constant 0 : index
    %c0_1 = arith.constant 0 : index
    %3 = vector.load %arg2[%c0, %c0_1] : memref<16x128xf32, #tpu.memory_space<vmem>>, vector<16x128xf32>
    %c0_2 = arith.constant 0 : index
    %c0_3 = arith.constant 0 : index
    %4 = vector.load %arg3[%c0_2, %c0_3] : memref<16x128xf32, #tpu.memory_space<vmem>>, vector<16x128xf32>
    %5 = arith.subf %3, %4 : vector<16x128xf32>
    %6 = arith.mulf %5, %5 : vector<16x128xf32>
    %7 = vector.shape_cast %6 : vector<16x128xf32> to vector<2x8x128xf32>
    %c0_4 = arith.constant 0 : index
    %c0_5 = arith.constant 0 : index
    %c0_6 = arith.constant 0 : index
    %8 = vector.load %arg4[%c0_4, %c0_5, %c0_6] : memref<1x8x128xf32, #tpu.memory_space<vmem>>, vector<1x8x128xf32>
    %cst = arith.constant dense<0.000000e+00> : vector<8x128xf32>
    %9 = vector.multi_reduction <add>, %7, %cst [0] : vector<2x8x128xf32> to vector<8x128xf32>
    %10 = vector.shape_cast %9 : vector<8x128xf32> to vector<1x8x128xf32>
    %11 = arith.addf %8, %10 : vector<1x8x128xf32>
    %c0_7 = arith.constant 0 : index
    %c0_8 = arith.constant 0 : index
    %c0_9 = arith.constant 0 : index
    %12 = vector.load %arg4[%c0_7, %c0_8, %c0_9] : memref<1x8x128xf32, #tpu.memory_space<vmem>>, vector<1x8x128xf32>
    tpu.vector_store %arg4[%c0_7, %c0_8, %c0_9], %11 {strides = array<i32>} : memref<1x8x128xf32, #tpu.memory_space<vmem>>, vector<1x8x128xf32>,
    return
  }
  func.func @transform_0(%arg0: i32, %arg1: i32) -> (i32, i32) {
    %c1_i32 = arith.constant 1 : i32
    %0 = arith.muli %arg0, %c1_i32 : i32
    %1 = arith.addi %0, %arg1 : i32
    %c0_i32 = arith.constant 0 : i32
    %2 = arith.minsi %1, %c0_i32 : i32
    %c0_i32_0 = arith.constant 0 : i32
    %c0_i32_1 = arith.constant 0 : i32
    return %2, %c0_i32_0 : i32, i32
  }
  func.func @transform_1(%arg0: i32, %arg1: i32) -> (i32, i32) {
    %c1_i32 = arith.constant 1 : i32
    %0 = arith.muli %arg0, %c1_i32 : i32
    %1 = arith.addi %0, %arg1 : i32
    %c0_i32 = arith.constant 0 : i32
    %2 = arith.minsi %1, %c0_i32 : i32
    %c0_i32_0 = arith.constant 0 : i32
    %c0_i32_1 = arith.constant 0 : i32
    return %2, %c0_i32_0 : i32, i32
  }
  func.func @transform_2(%arg0: i32, %arg1: i32) -> (i32, i32, i32) {
    %c0_i32 = arith.constant 0 : i32
    %c0_i32_0 = arith.constant 0 : i32
    %c0_i32_1 = arith.constant 0 : i32
    return %arg0, %c0_i32, %c0_i32_0 : i32, i32, i32
  }
}

</mosaic_0001>

<bundles_post_ra>
// kernel: vae_loss.1
= control target key start
LH: loop header
LB: loop body
LE: loop exit
PB: predicated region body
PF: predicated region fallthrough
CT: control target
= control target key end

     0   :  { %s139_s0 = inlined_call_operand.vmem [shape: f32[16,128], index: 0, kind: input, shape index: {}]   ;;  %s140_s1 = inlined_call_operand.vmem [shape: f32[16,128], index: 1, kind: input, shape index: {}]   ;;  %s141_s2 = inlined_call_operand.vmem [shape: f32[1,8,128], index: 2, kind: output, shape index: {}]  }
   0x1   :  { %v80_v0 = vld [vmem:[%s139_s0] sm:$0xff]  ;;  %v81_v1 = vld [vmem:[%s139_s0 + $0x8] sm:$0xff] }
   0x2   :  { %v82_v2 = vld [vmem:[%s140_s1] sm:$0xff]  ;;  %v83_v3 = vld [vmem:[%s140_s1 + $0x8] sm:$0xff] }
   0x3   :  { %v84_v4 = vsub.f32 %v80_v0, %v82_v2  ;;  %v85_v5 = vsub.f32 %v81_v1, %v83_v3 }
   0x5   :  { %v86_v6 = vmul.f32 %v84_v4, %v84_v4  ;;  %v87_v7 = vmul.f32 %v85_v5, %v85_v5 }
   0x7   :  { %v89_v8 = vadd.f32 %v87_v7, %v86_v6 }
   0x9   :  { %91 = vst [vmem:[%s141_s2] sm:$0xff] %v89_v8 }

</bundles_post_ra>
